<compile_context>
chip_gen: v6e
topology: v6e:2x2x1
jax: 0.10.0
libtpu: 0.0.40
codegen_flags: <defaults>
</compile_context>

<pallas_src>
import functools

import jax
import jax.numpy as jnp
from jax.experimental import pallas as pl
from jax.experimental.pallas import tpu as pltpu


def _make_layernorm_kernel(eps: float, n_channels: int):
    inv_c = 1.0 / float(n_channels)
    # Bessel correction (torch.std default).  Note: for C == 1 this yields
    # var = 0 whereas torch.std(ddof=1) would produce NaN (documented edge).
    inv_cm1 = 1.0 / float(max(n_channels - 1, 1))

    def kernel(x_ref, a_ref, b_ref, o_ref):
        # x_ref: (BN, C, T) block ; a_ref / b_ref: (1, C, 1)
        x = x_ref[...].astype(jnp.float32)

        # Two-pass mean / unbiased variance over the channel axis.  The extra
        # VPU pass is free in this HBM-bound regime and avoids cancellation of
        # the single-pass sum / sum-of-squares formulation.
        mu = jnp.sum(x, axis=1, keepdims=True) * inv_c            # (BN, 1, T)
        xc = x - mu
        var = jnp.sum(xc * xc, axis=1, keepdims=True) * inv_cm1   # (BN, 1, T)

        # One reciprocal per spatial position on the EUP; a single Newton step
        # restores full f32 precision (approx rcp error e -> e^2).
        denom = jnp.sqrt(var) + eps
        inv = pl.reciprocal(denom, approx=True)
        inv = inv * (2.0 - denom * inv)

        a = a_ref[...].astype(jnp.float32)                        # (1, C, 1)
        b = b_ref[...].astype(jnp.float32)
        o_ref[...] = (xc * inv * a + b).astype(o_ref.dtype)

    return kernel


def _choose_tiles(N, C, HW, itemsize):
    """Pick (BN, HW_TILE, in_buffers, vmem_limit_bytes), generation-aware."""
    try:
        vmem_cap = int(pltpu.get_tpu_info().vmem_capacity_bytes)
    except Exception:
        vmem_cap = 64 * 1024 * 1024  # conservative fallback (v7x-sized VMEM)

    if vmem_cap >= 100 * 1024 * 1024:
        # v5e / v6e: 128 MiB physical VMEM -> big blocks, deeper input pipeline.
        total_budget = 40 * 1024 * 1024
        vmem_limit = 64 * 1024 * 1024
        in_buffers = 3
    else:
        # v7x: 64 MiB physical VMEM, 2 TensorCores.  Keep the whole pipeline
        # around ~20 MiB and never raise the scoped limit past ~48 MiB.
        total_budget = 20 * 1024 * 1024
        vmem_limit = 40 * 1024 * 1024
        in_buffers = 2

    # Sublane packing: f32 -> 8 rows/vreg, bf16 -> 16, int8/fp8 -> 32.  C sits
    # on the sublane axis of the block, so small C pads up in VMEM.
    sublanes = 8 * max(1, 4 // int(itemsize))
    c_eff = -(-C // sublanes) * sublanes
    # TODO(synk): fold batch into the sublane axis ((N*C, HW) layout + strided
    # sublane reduction) to recover the C<8 sublane waste instead of only
    # accounting for it in the VMEM budget.

    # Bytes per block element across the pipeline: in/out copies at the input
    # dtype plus ~2 f32 compute temporaries (centered x, result) in VMEM.
    per_elem = (in_buffers + 2) * int(itemsize) + 2 * 4
    max_block_elems = max(total_budget // per_elem, 8 * 128)

    # Spatial tile: lane-dense multiple of 128; grow it first, then add batch.
    hw_groups = -(-HW // 128)                            # 128-lane groups needed
    max_groups = max(max_block_elems // (c_eff * 128), 1)
    hw_tile = 128 * min(hw_groups, max_groups)

    bn = max(1, min(N, max_block_elems // (c_eff * hw_tile)))

    # Guarantee >=2 grid programs so v7x can shard across both TensorCores
    # (costs only one extra ~0.35us grid step on single-TC chips).
    def n_programs(bn_, t_):
        return (-(-N // bn_)) * (-(-HW // t_))

    if n_programs(bn, hw_tile) < 2:
        if hw_tile >= 256:
            hw_tile = 128 * ((hw_groups + 1) // 2)       # split the spatial axis
        elif bn >= 2:
            bn = (bn + 1) // 2                           # else split the batch axis
        # else: tiny single-block input; nothing worth splitting.

    return bn, hw_tile, in_buffers, vmem_limit


def _input_spec(block_shape, index_map, n_buffers):
    """BlockSpec with optional 3-deep pipelining; falls back to default 2."""
    if n_buffers > 2:
        try:
            return pl.BlockSpec(block_shape, index_map,
                                pipeline_mode=pl.Buffered(n_buffers))
        except (TypeError, AttributeError):
            pass  # older API surface: use the default double buffering
    return pl.BlockSpec(block_shape, index_map)


@functools.partial(jax.jit, static_argnames=("eps",))
def layer_normal(z, a_2, b_2, eps=1e-09):
    """z: (N, C, H, W). a_2, b_2: (1, C, 1, 1). Returns (N, C, H, W)."""
    N, C, H, W = z.shape
    HW = H * W
    itemsize = jnp.dtype(z.dtype).itemsize
    bn, hw_tile, in_buffers, vmem_limit = _choose_tiles(N, C, HW, itemsize)

    # No host-side pad/slice: cdiv grid + Pallas boundary masking handle any
    # ragged last tile, so the tensor makes exactly one HBM round trip.
    x = z.reshape(N, C, HW)
    a = a_2.reshape(1, C, 1)
    b = b_2.reshape(1, C, 1)

    grid = (pl.cdiv(N, bn), pl.cdiv(HW, hw_tile))
    kernel = _make_layernorm_kernel(float(eps), C)

    out = pl.pallas_call(
        kernel,
        out_shape=jax.ShapeDtypeStruct((N, C, HW), z.dtype),
        grid_spec=pltpu.PrefetchScalarGridSpec(
            num_scalar_prefetch=0,
            grid=grid,
            in_specs=[
                _input_spec((bn, C, hw_tile), lambda n, s: (n, 0, s), in_buffers),
                pl.BlockSpec((1, C, 1), lambda n, s: (0, 0, 0)),
                pl.BlockSpec((1, C, 1), lambda n, s: (0, 0, 0)),
            ],
            out_specs=pl.BlockSpec((bn, C, hw_tile), lambda n, s: (n, 0, s)),
        ),
        compiler_params=pltpu.CompilerParams(
            dimension_semantics=("parallel", "parallel"),
            vmem_limit_bytes=vmem_limit,
        ),
    )(x, a, b)

    return out.reshape(N, C, H, W)


if __name__ == "__main__":
    key = jax.random.PRNGKey(0)
    N, C, H, W = 2, 4, 16, 16

    z = jax.random.normal(key, (N, C, H, W), dtype=jnp.float32)

    # Deterministic parameter init, matching the module's __init__:
    # a_2 = ones(1, d_hid, 1, 1), b_2 = zeros(1, d_hid, 1, 1)
    a_2 = jnp.ones((1, C, 1, 1), dtype=jnp.float32)
    b_2 = jnp.zeros((1, C, 1, 1), dtype=jnp.float32)

    out = layer_normal(z, a_2, b_2, eps=1e-09)
    out = jax.block_until_ready(out)

    # Reference check in plain JAX (same semantics as the torch forward).
    mu = jnp.mean(z, axis=1, keepdims=True)
    sigma = jnp.std(z, axis=1, keepdims=True, ddof=1)
    ref = (z - mu) / (sigma + 1e-09) * a_2 + b_2

    assert jnp.allclose(out, ref, atol=1e-5, rtol=1e-5), "mismatch vs reference"
    print("KERNEL_OK")
</pallas_src>

<mosaic_0001>
module attributes {stable_mosaic.version = 11 : i64} {
  func.func @kernel(%arg0: i32, %arg1: i32, %arg2: memref<2x4x128xf32, #tpu.memory_space<vmem>>, %arg3: memref<1x4x1xf32, #tpu.memory_space<vmem>>, %arg4: memref<1x4x1xf32, #tpu.memory_space<vmem>>, %arg5: memref<2x4x128xf32, #tpu.memory_space<vmem>>) attributes {dimension_semantics = [#tpu.dimension_semantics<parallel>, #tpu.dimension_semantics<parallel>], iteration_bounds = array<i64: 1, 2>, scalar_prefetch = 0 : i64, scratch_operands = 0 : i64, tpu.core_type = #tpu.core_type<tc>, window_params = [{transform_indices = @transform_0, window_bounds = array<i64: 2, 4, 128>}, {pipeline_mode = #tpu.pipeline_mode<synchronous>, transform_indices = @transform_1, window_bounds = array<i64: 1, 4, 1>}, {pipeline_mode = #tpu.pipeline_mode<synchronous>, transform_indices = @transform_2, window_bounds = array<i64: 1, 4, 1>}, {transform_indices = @transform_3, window_bounds = array<i64: 2, 4, 128>}]} {
    %c0 = arith.constant 0 : index
    %c0_0 = arith.constant 0 : index
    %c0_1 = arith.constant 0 : index
    %0 = vector.load %arg2[%c0, %c0_0, %c0_1] : memref<2x4x128xf32, #tpu.memory_space<vmem>>, vector<2x4x128xf32>
    %cst = arith.constant dense<0.000000e+00> : vector<2x128xf32>
    %1 = vector.multi_reduction <add>, %0, %cst [1] : vector<2x4x128xf32> to vector<2x128xf32>
    %2 = vector.shape_cast %1 : vector<2x128xf32> to vector<2x1x128xf32>
    %cst_2 = arith.constant 2.500000e-01 : f32
    %3 = vector.broadcast %cst_2 : f32 to vector<2x1x128xf32>
    %4 = arith.mulf %2, %3 : vector<2x1x128xf32>
    %5 = vector.broadcast %4 : vector<2x1x128xf32> to vector<2x4x128xf32>
    %6 = arith.subf %0, %5 : vector<2x4x128xf32>
    %7 = arith.mulf %6, %6 : vector<2x4x128xf32>
    %cst_3 = arith.constant dense<0.000000e+00> : vector<2x128xf32>
    %8 = vector.multi_reduction <add>, %7, %cst_3 [1] : vector<2x4x128xf32> to vector<2x128xf32>
    %9 = vector.shape_cast %8 : vector<2x128xf32> to vector<2x1x128xf32>
    %cst_4 = arith.constant 0.333333343 : f32
    %10 = vector.broadcast %cst_4 : f32 to vector<2x1x128xf32>
    %11 = arith.mulf %9, %10 : vector<2x1x128xf32>
    %12 = math.sqrt %11 : vector<2x1x128xf32>
    %cst_5 = arith.constant 9.99999971E-10 : f32
    %13 = vector.broadcast %cst_5 : f32 to vector<2x1x128xf32>
    %14 = arith.addf %12, %13 : vector<2x1x128xf32>
    %15 = tpu.reciprocal %14 {approx = true} : vector<2x1x128xf32> -> vector<2x1x128xf32>
    %16 = arith.mulf %14, %15 : vector<2x1x128xf32>
    %cst_6 = arith.constant 2.000000e+00 : f32
    %17 = vector.broadcast %cst_6 : f32 to vector<2x1x128xf32>
    %18 = arith.subf %17, %16 : vector<2x1x128xf32>
    %19 = arith.mulf %15, %18 : vector<2x1x128xf32>
    %c0_7 = arith.constant 0 : index
    %c0_8 = arith.constant 0 : index
    %c0_9 = arith.constant 0 : index
    %20 = vector.load %arg3[%c0_7, %c0_8, %c0_9] : memref<1x4x1xf32, #tpu.memory_space<vmem>>, vector<1x4x1xf32>
    %c0_10 = arith.constant 0 : index
    %c0_11 = arith.constant 0 : index
    %c0_12 = arith.constant 0 : index
    %21 = vector.load %arg4[%c0_10, %c0_11, %c0_12] : memref<1x4x1xf32, #tpu.memory_space<vmem>>, vector<1x4x1xf32>
    %22 = vector.broadcast %19 : vector<2x1x128xf32> to vector<2x4x128xf32>
    %23 = arith.mulf %6, %22 : vector<2x4x128xf32>
    %24 = vector.broadcast %20 : vector<1x4x1xf32> to vector<2x4x128xf32>
    %25 = arith.mulf %23, %24 : vector<2x4x128xf32>
    %26 = vector.broadcast %21 : vector<1x4x1xf32> to vector<2x4x128xf32>
    %27 = arith.addf %25, %26 : vector<2x4x128xf32>
    %c0_13 = arith.constant 0 : index
    %c0_14 = arith.constant 0 : index
    %c0_15 = arith.constant 0 : index
    %28 = vector.load %arg5[%c0_13, %c0_14, %c0_15] : memref<2x4x128xf32, #tpu.memory_space<vmem>>, vector<2x4x128xf32>
    tpu.vector_store %arg5[%c0_13, %c0_14, %c0_15], %27 {strides = array<i32>} : memref<2x4x128xf32, #tpu.memory_space<vmem>>, vector<2x4x128xf32>,
    return
  }
  func.func @transform_0(%arg0: i32, %arg1: i32) -> (i32, i32, i32) {
    %c0_i32 = arith.constant 0 : i32
    %c0_i32_0 = arith.constant 0 : i32
    return %arg0, %c0_i32, %arg1 : i32, i32, i32
  }
  func.func @transform_1(%arg0: i32, %arg1: i32) -> (i32, i32, i32) {
    %c0_i32 = arith.constant 0 : i32
    %c0_i32_0 = arith.constant 0 : i32
    %c0_i32_1 = arith.constant 0 : i32
    %c0_i32_2 = arith.constant 0 : i32
    return %c0_i32, %c0_i32_0, %c0_i32_1 : i32, i32, i32
  }
  func.func @transform_2(%arg0: i32, %arg1: i32) -> (i32, i32, i32) {
    %c0_i32 = arith.constant 0 : i32
    %c0_i32_0 = arith.constant 0 : i32
    %c0_i32_1 = arith.constant 0 : i32
    %c0_i32_2 = arith.constant 0 : i32
    return %c0_i32, %c0_i32_0, %c0_i32_1 : i32, i32, i32
  }
  func.func @transform_3(%arg0: i32, %arg1: i32) -> (i32, i32, i32) {
    %c0_i32 = arith.constant 0 : i32
    %c0_i32_0 = arith.constant 0 : i32
    return %arg0, %c0_i32, %arg1 : i32, i32, i32
  }
}

</mosaic_0001>

<bundles_post_ra>
// kernel: layer_normal.1
= control target key start
LH: loop header
LB: loop body
LE: loop exit
PB: predicated region body
PF: predicated region fallthrough
CT: control target
= control target key end

     0   :  { %s566_s12 = smov 0   ;;  %s568_s13 = smov 0   ;;  %s652_s0 = inlined_call_operand.vmem [shape: f32[2,4,256], index: 0, kind: input, shape index: {}]   ;;  %s653_s1 = inlined_call_operand.vmem [shape: f32[1,4,1], index: 1, kind: input, shape index: {}]   ;;  %s654_s2 = inlined_call_operand.vmem [shape: f32[1,4,1], index: 2, kind: input, shape index: {}]   ;;  %s655_s3 = inlined_call_operand.vmem [shape: f32[2,4,256], index: 3, kind: output, shape index: {}]  }
   0x1   :  { %s570_s14 = smov 0   ;;  %s572_s15 = smov 0  }
   0x2   :  { %s574_s16 = smov 0  }
   0x3 LB: > { %s22_s17 = sadd.s32 1, %s539_s15  ;;  %s442_s18 = sadd.s32 4294967295, %s543_s16   ;;  %s543_s16 = sphi %s574_s16, %s13_s16   ;;  %s539_s15 = sphi %s572_s15, %s660_s15   ;;  %s535_s14 = sphi %s570_s14, %s659_s14   ;;  %s531_s13 = sphi %s568_s13, %s658_s13   ;;  %s527_s12 = sphi %s566_s12, %s657_s12  }
   0x4   : > { %p23_p0 = scmp.ge.s32.totalorder %s22_s17, 2  ;;  %p41_p1 = scmp.ne.s32.totalorder %s531_s13, %s527_s12 }
   0x5   : > { %p42_p2 = scmp.eq.s32.totalorder %s543_s16, 0  ;;  %p115_p4 = scmp.eq.s32.totalorder %s442_s18, 1 }
   0x6   : > { %s662_s17 = smov (%p23_p0, %s22_s17), 0  ;;  %s34_s20 = sadd.s32 1, %s531_s13 }
   0x7   : > { %p43_p3 = por %p42_p2, %p41_p1  ;;  %s30_s19 = ssub.s32 %s539_s15, %s662_s17 }
   0x8   : > { %p32_p5 = scmp.eq.s32.totalorder %s30_s19, 0  ;;  %p601_p6 = por %p115_p4, %p41_p1 }
   0x9   : > { %p445_p7 = scmp.ge.s32.totalorder %s543_s16, 2 }
   0xa   : > { %s606_s22 = scalar_select %p32_p5, %s531_s13, %s34_s20  }
   0xb   : > { %143 = sbr.rel (%p445_p7) target bundleno = 21 (0x15), region = 24 }
  0x10   : > { %146 = sbr.rel (!%p43_p3) target bundleno = 21 (0x15), region = 28  ;;  %s148_s23 = sand.u32 (%p43_p3), 1, %s531_s13  }
  0x11   : > { %s447_s24 = sshll.u32 (%p43_p3), %s539_s15, 2  ;;  %s446_s25 = sshll.u32 (%p43_p3), %s148_s23, 3 }
  0x12   : > { %s155_s28 = scalar_lea.vmem (%p43_p3), %s652_s0, %s447_s24  ;;  %s150_s29 = scalar_lea.vmem (%p43_p3), [#allocation2], %s446_s25 }
  0x13   : > { %v172_v0 = vld [vmem:[%s155_s28] sm:$0xf] (%p43_p3)  ;;  %v174_v1 = vld [vmem:[%s155_s28 + $0x8] sm:$0xf] (%p43_p3) }
  0x14   : > { %173 = vst [vmem:[%s150_s29] sm:$0xf] (%p43_p3), %v172_v0  ;;  %175 = vst [vmem:[%s150_s29 + $0x4] sm:$0xf] (%p43_p3), %v174_v1 }
  0x15 PF: > { %p448_p8 = scmp.ge.s32.totalorder %s543_s16, 1  ;;  %p202_p9 = scmp.lt.s32.totalorder %s543_s16, 3 }
  0x17   : > { %p203_p10 = pnand %p448_p8, %p202_p9 }
  0x18   : > { %s209_s5 = sand.u32 (!%p203_p10), 1, %s527_s12  }
  0x19   : > { %206 = sbr.rel (%p203_p10) target bundleno = 171 (0xab), region = 69  ;;  %s620_s6 = sshll.u32 (!%p203_p10), %s209_s5, 3 }
  0x1a   : > { %s211_s9 = scalar_lea.vmem (!%p203_p10), [#allocation2], %s620_s6  ;;  %s230_s10 = scalar_lea.vmem (!%p203_p10), [#allocation3], %s620_s6 }
  0x1e   : > { %v296_v2 = vld [vmem:[%s653_s1] sm:$0xf]  ;;  %v545_v3 = vmov 0   ;;  %vm235_vm0 = vcmask 1043456   ;;  %v234_v6 = vld [vmem:[%s211_s9 + $0x4] sm:$0xf] }
  0x1f   : > { %496 = vset.pattern.permute.xlu0 %v545_v3  ;;  %v297_v4 = vld [vmem:[%s654_s2] sm:$0xf]  ;;  %v243_v8 = vsel %vm235_vm0, %v234_v6, 0.0  ;;  %s452_s11 = sshll.u32 (%p601_p6), %s535_s14, 2 }
  0x20   : > { %302 = vperm.xlu0 %496, %v296_v2   ;;  %v233_v5 = vld [vmem:[%s211_s9] sm:$0xf]  ;;  %v244_v10 = vrot.slane %v243_v8, 4  ;;  %s327_s19 = scalar_lea.vmem (%p601_p6), %s655_s3, %s452_s11 }
  0x21   : > { %v236_v7 = vsel %vm235_vm0, %v233_v5, 0.0 }
  0x22   : > { %v237_v9 = vrot.slane %v236_v7, 4  ;;  %v245_v12 = vadd.f32 %v244_v10, %v243_v8 }
  0x24   : > { %309 = vperm.xlu0 %496, %v297_v4   ;;  %v238_v11 = vadd.f32 %v237_v9, %v236_v7  ;;  %v246_v14 = vrot.slane %v245_v12, 2 }
  0x26   : > { %v239_v13 = vrot.slane %v238_v11, 2  ;;  %v247_v16 = vadd.f32 %v246_v14, %v245_v12 }
  0x28   : > { %v240_v15 = vadd.f32 %v239_v13, %v238_v11  ;;  %v248_v18 = vrot.slane %v247_v16, 1 }
  0x2a   : > { %v241_v17 = vrot.slane %v240_v15, 1  ;;  %v249_v20 = vadd.f32 %v248_v18, %v247_v16 }
  0x2c   : > { %v242_v19 = vadd.f32 %v241_v17, %v240_v15  ;;  %v251_v22 = vmul.f32 0.25, %v249_v20 }
  0x2e   : > { %v250_v21 = vmul.f32 0.25, %v242_v19  ;;  %v253_v24 = vsub.f32 %v234_v6, %v251_v22 }
  0x30   : > { %v252_v23 = vsub.f32 %v233_v5, %v250_v21  ;;  %v255_v26 = vmul.f32 %v253_v24, %v253_v24 }
  0x32   : > { %v254_v25 = vmul.f32 %v252_v23, %v252_v23  ;;  %v263_v28 = vsel %vm235_vm0, %v255_v26, 0.0 }
  0x33   : > { %v264_v30 = vrot.slane %v263_v28, 4 }
  0x34   : > { %v256_v27 = vsel %vm235_vm0, %v254_v25, 0.0 }
  0x35   : > { %v257_v29 = vrot.slane %v256_v27, 4  ;;  %v265_v32 = vadd.f32 %v264_v30, %v263_v28 }
  0x37   : > { %v258_v31 = vadd.f32 %v257_v29, %v256_v27  ;;  %v266_v34 = vrot.slane %v265_v32, 2 }
  0x39   : > { %v259_v33 = vrot.slane %v258_v31, 2  ;;  %v267_v36 = vadd.f32 %v266_v34, %v265_v32 }
  0x3b   : > { %v260_v35 = vadd.f32 %v259_v33, %v258_v31  ;;  %v268_v38 = vrot.slane %v267_v36, 1 }
  0x3d   : > { %v261_v37 = vrot.slane %v260_v35, 1  ;;  %v269_v40 = vadd.f32 %v268_v38, %v267_v36 }
  0x3f   : > { %v262_v39 = vadd.f32 %v261_v37, %v260_v35  ;;  %v271_v42 = vmul.f32 0.33333334, %v269_v40 }
  0x41   : > { %v270_v41 = vmul.f32 0.33333334, %v262_v39  ;;  %vm281_vm2 = vcmp.eq.f32.partialorder %v271_v42, inf  ;;  %v284_v49 = vand.u32 2147483648, %v271_v42  ;;  %vm283_vm4 = vcmp.eq.f32.partialorder %v271_v42, 0.0 }
  0x43   : > { %497 = vrsqrt.f32 %v270_v41  ;;  %vm274_vm1 = vcmp.eq.f32.partialorder %v270_v41, inf  ;;  %v277_v47 = vand.u32 2147483648, %v270_v41  ;;  %vm276_vm3 = vcmp.eq.f32.partialorder %v270_v41, 0.0 }
  0x44   : > { %499 = vrsqrt.f32 %v271_v42 }
  0x50   : > { %v498_v43 = vpop.eup %497 }
  0x51   : > { %v500_v44 = vpop.eup %499  ;;  %v273_v45 = vmul.f32 %v498_v43, %v270_v41 }
  0x52   : > { %v280_v46 = vmul.f32 %v500_v44, %v271_v42 }
  0x53   : > { %v275_v48 = vsel %vm274_vm1, %v270_v41, %v273_v45 }
  0x54   : > { %v282_v50 = vsel %vm281_vm2, %v271_v42, %v280_v46  ;;  %v278_v51 = vsel %vm276_vm3, %v277_v47, %v275_v48 }
  0x55   : > { %v285_v52 = vsel %vm283_vm4, %v284_v49, %v282_v50  ;;  %v286_v53 = vadd.f32 1e-09, %v278_v51 }
  0x56   : > { %v287_v54 = vadd.f32 1e-09, %v285_v52 }
  0x57   : > { %501 = vrcp.f32 %v286_v53 }
  0x58   : > { %503 = vrcp.f32 %v287_v54 }
  0x64   : > { %v502_v55 = vpop.eup %501 }
  0x65   : > { %v504_v56 = vpop.eup %503  ;;  %v290_v57 = vmul.f32 %v502_v55, %v286_v53 }
  0x66   : > { %v291_v58 = vmul.f32 %v504_v56, %v287_v54 }
  0x67   : > { %v292_v59 = vsub.f32 2.0, %v290_v57 }
  0x68   : > { %v293_v60 = vsub.f32 2.0, %v291_v58 }
  0x69   : > { %v294_v61 = vmul.f32 %v502_v55, %v292_v59 }
  0x6a   : > { %v295_v62 = vmul.f32 %v504_v56, %v293_v60 }
  0x6b   : > { %v298_v63 = vmul.f32 %v294_v61, %v252_v23 }
  0x6c   : > { %v299_v0 = vmul.f32 %v295_v62, %v253_v24 }
  0x9b   : > { %v303_v1 = vpop.permute.xlu0 %302 }
  0x9c   : > { %v305_v2 = vmul.f32 %v303_v1, %v298_v63  ;;  %v306_v3 = vmul.f32 %v303_v1, %v299_v0 }
  0x9e   : > { %322 = sbr.rel (!%p601_p6) target bundleno = 171 (0xab), region = 77 }
  0x9f   : > { %v310_v4 = vpop.permute.xlu0 %309 }
  0xa0   : > { %v312_v5 = vadd.f32 %v310_v4, %v305_v2  ;;  %v313_v6 = vadd.f32 %v310_v4, %v306_v3 }
  0xa2   : > { %314 = vst [vmem:[%s230_s10] sm:$0xf] %v312_v5  ;;  %315 = vst [vmem:[%s230_s10 + $0x4] sm:$0xf] %v313_v6 }
  0xa9   : > { %v344_v7 = vld [vmem:[%s230_s10] sm:$0xf]  ;;  %v346_v8 = vld [vmem:[%s230_s10 + $0x4] sm:$0xf] }
  0xaa   : > { %345 = vst [vmem:[%s327_s19] sm:$0xf] %v344_v7  ;;  %347 = vst [vmem:[%s327_s19 + $0x8] sm:$0xf] %v346_v8 }
  0xab PF: > { %s13_s16 = sadd.s32 1, %s543_s16   ;;  %s657_s12 = smov %s531_s13 }
  0xac   : > { %p10_p11 = scmp.ge.s32.totalorder %s13_s16, 4   ;;  %s658_s13 = smov %s606_s22 }
  0xad   : > { %s659_s14 = smov %s539_s15  ;;  %s660_s15 = smov %s662_s17 }
  0xae   :  { %12 = sbr.rel (!%p10_p11) target bundleno = 3 (0x3), region = 149 }

</bundles_post_ra>
